<compile_context>
chip_gen: v6e
topology: v6e:2x2x1
jax: 0.10.0
libtpu: 0.0.40
codegen_flags: <defaults>
</compile_context>

<pallas_src>
import jax
import jax.numpy as jnp
import numpy as np
from jax.experimental import pallas as pl
from jax.experimental.pallas import tpu as pltpu

_C_PAD = 8  # pad every channel dim to one full sublane group


def _layer_geometry(h, w, cin, cout):
    wp, hp = w + 2, h + 2
    L = h * wp                  # conv-output positions computed (incl. a few tail garbage)
    a_len = L + 2 * wp + 2      # padded-grid length; keeps every tap slice in bounds
    return dict(H=h, W=w, Hp=hp, Wp=wp, L=L, A_len=a_len, Cin=cin, Cout=cout)


def _make_fused_kernel(cfgs, images_per_step):
    def kernel(*refs):
        x_ref = refs[0]
        o_ref = refs[-1]
        lrefs = refs[1:-1]                        # (w_taps, bias, sel) per layer

        for b in range(images_per_step):
            a = x_ref[b]                          # (C_PAD, A_len0), spatial on lanes
            for l, cfg in enumerate(cfgs):
                w_ref, b_ref, s_ref = lrefs[3 * l:3 * l + 3]
                Wp, L = cfg["Wp"], cfg["L"]

                # ---- 3x3 conv: 9 accumulated matmuls over lane-shifted taps ----
                y = None
                for t, off in enumerate(
                        kh * Wp + kw for kh in range(3) for kw in range(3)):
                    p = jnp.dot(w_ref[t], a[:, off:off + L],
                                preferred_element_type=jnp.float32)
                    y = p if y is None else y + p
                y = jnp.maximum(y + b_ref[...], 0.0)          # bias + ReLU

                # ---- 2x2 stride-2 max pool: two lane-shifted maxima ... --------
                lv = L - Wp
                yv = jnp.maximum(y[:, :lv], y[:, Wp:Wp + lv])
                lh = lv - 1
                yh = jnp.maximum(yv[:, :lh], yv[:, 1:1 + lh])
                # ... then one 0/1 gather matmul: picks the stride-2 window maxima
                # and scatters them straight into the next layer's zero-padded
                # flattened grid (or, for the last layer, the output layout).
                a = jnp.dot(yh, s_ref[...], preferred_element_type=jnp.float32)

            o_ref[b] = a                           # (C_PAD, Hn*Wn)

    return kernel


@jax.jit
def conv_interp_forward(x_nchw, params):
    """Fused ConvInterp.forward: NCHW in -> NCHW out, like the PyTorch module."""
    N, C0, H, W = x_nchw.shape

    cfgs = []
    h, w, cin = H, W, C0
    for wgt, _ in params:
        cout = wgt.shape[0]
        assert wgt.shape == (cout, cin, 3, 3), wgt.shape
        assert h % 2 == 0 and w % 2 == 0
        assert max(cin, cout) <= _C_PAD
        cfgs.append(_layer_geometry(h, w, cin, cout))
        h, w, cin = h // 2, w // 2, cout
    Hn, Wn, Cn = h, w, cin

    # ---------- host-side prep (tiny one-time XLA glue) ----------------------
    c0 = cfgs[0]
    # Layer-0 activations: channel-padded, spatially zero-padded and flattened
    # so element (c, (1+i)*Wp + (1+j)) == x[c, i, j]; spatial index on lanes.
    x_pad = jnp.pad(x_nchw.astype(jnp.float32),
                    ((0, 0), (0, _C_PAD - C0), (1, 1), (1, 1)))
    x_pad = x_pad.reshape(N, _C_PAD, c0["Hp"] * c0["Wp"])
    x_pad = jnp.pad(x_pad, ((0, 0), (0, 0),
                            (0, c0["A_len"] - c0["Hp"] * c0["Wp"])))

    const_inputs = []
    for l, ((wgt, bias), cfg) in enumerate(zip(params, cfgs)):
        cin_l, cout_l = cfg["Cin"], cfg["Cout"]
        # (Cout, Cin, 3, 3) -> (9, C_PAD, C_PAD) per-tap matmul weights.
        wt = jnp.transpose(wgt, (2, 3, 0, 1)).reshape(9, cout_l, cin_l)
        wt = jnp.pad(wt, ((0, 0), (0, _C_PAD - cout_l), (0, _C_PAD - cin_l)))
        bb = jnp.pad(bias.reshape(cout_l, 1), ((0, _C_PAD - cout_l), (0, 0)))
        # 0/1 gather matrix: fuses the stride-2 pool pick with the next layer's
        # padded-grid scatter (zero border for free), or the final flatten.
        h2, w2 = cfg["H"] // 2, cfg["W"] // 2
        lh = cfg["L"] - cfg["Wp"] - 1
        if l + 1 < len(cfgs):
            ncols, nwp = cfgs[l + 1]["A_len"], cfgs[l + 1]["Wp"]
            def dst(i2, j2, _wp=nwp):
                return (1 + i2) * _wp + (1 + j2)
        else:
            ncols = Hn * Wn
            def dst(i2, j2, _wn=Wn):
                return i2 * _wn + j2
        sel = np.zeros((lh, ncols), np.float32)
        for i2 in range(h2):
            for j2 in range(w2):
                sel[2 * i2 * cfg["Wp"] + 2 * j2, dst(i2, j2)] = 1.0
        const_inputs += [wt, bb, jnp.asarray(sel)]

    # ---------- batch blocking ------------------------------------------------
    # Keep two "parallel" grid steps when the batch allows it (both v7x cores
    # get work); fold any remaining images into each step's unrolled body.
    num_steps = 2 if (N >= 2 and N % 2 == 0) else N
    images_per_step = N // num_steps

    x_spec = pl.BlockSpec((images_per_step, _C_PAD, c0["A_len"]),
                          lambda s: (s, 0, 0))
    const_specs = [
        pl.BlockSpec(arr.shape, (lambda s: (0, 0, 0)) if arr.ndim == 3
                     else (lambda s: (0, 0)))
        for arr in const_inputs
    ]
    out_spec = pl.BlockSpec((images_per_step, _C_PAD, Hn * Wn),
                            lambda s: (s, 0, 0))

    out = pl.pallas_call(
        _make_fused_kernel(cfgs, images_per_step),
        out_shape=jax.ShapeDtypeStruct((N, _C_PAD, Hn * Wn), jnp.float32),
        grid_spec=pltpu.PrefetchScalarGridSpec(
            num_scalar_prefetch=0,
            grid=(num_steps,),
            in_specs=[x_spec] + const_specs,
            out_specs=out_spec),
        compiler_params=pltpu.CompilerParams(
            dimension_semantics=("parallel",)),
    )(x_pad, *const_inputs)

    # (N, C_PAD, Hn*Wn) -> NCHW; drops channel padding, no transpose needed.
    return out[:, :Cn, :].reshape(N, Cn, Hn, Wn)


def _reference_forward(x, params):
    for w, b in params:
        y = jax.lax.conv_general_dilated(
            x, w, window_strides=(1, 1), padding=((1, 1), (1, 1)),
            dimension_numbers=("NCHW", "OIHW", "NCHW"),
            precision=jax.lax.Precision.HIGHEST)
        y = jnp.maximum(y + b[None, :, None, None], 0.0)
        x = jax.lax.reduce_window(y, -jnp.inf, jax.lax.max,
                                  (1, 1, 2, 2), (1, 1, 2, 2), "VALID")
    return x


def init_params(key, in_channels, base_channels=4, hidden_layers=2, ksize=3):
    params = []
    for layer_index in range(hidden_layers):
        in_ch = in_channels if layer_index == 0 else base_channels * 2 ** (layer_index - 1)
        out_ch = base_channels * 2 ** layer_index
        key, kw, kb = jax.random.split(key, 3)
        fan_in = in_ch * ksize * ksize
        w = jax.random.normal(kw, (out_ch, in_ch, ksize, ksize), jnp.float32) / np.sqrt(fan_in)
        b = 0.05 * jax.random.normal(kb, (out_ch,), jnp.float32)
        params.append((w, b))
    return params


if __name__ == "__main__":
    key = jax.random.PRNGKey(0)
    key, kx = jax.random.split(key)
    # Input matches the PyTorch NCHW convention: batch=2, in_channels=4, 16x16.
    x = jax.random.normal(kx, (2, 4, 16, 16), jnp.float32)
    params = init_params(key, in_channels=4, base_channels=4, hidden_layers=2)

    y = jax.block_until_ready(conv_interp_forward(x, params))
    assert y.shape == (2, 8, 4, 4), y.shape

    y_ref = jax.block_until_ready(_reference_forward(x, params))
    np.testing.assert_allclose(np.asarray(y), np.asarray(y_ref), rtol=1e-4, atol=1e-4)
    print("KERNEL_OK")
</pallas_src>

<mosaic_0001>
module attributes {stable_mosaic.version = 11 : i64} {
  func.func @kernel(%arg0: i32, %arg1: memref<1x8x326xf32, #tpu.memory_space<vmem>>, %arg2: memref<9x8x8xf32, #tpu.memory_space<vmem>>, %arg3: memref<8x1xf32, #tpu.memory_space<vmem>>, %arg4: memref<269x102xf32, #tpu.memory_space<vmem>>, %arg5: memref<9x8x8xf32, #tpu.memory_space<vmem>>, %arg6: memref<8x1xf32, #tpu.memory_space<vmem>>, %arg7: memref<69x16xf32, #tpu.memory_space<vmem>>, %arg8: memref<1x8x16xf32, #tpu.memory_space<vmem>>) attributes {dimension_semantics = [#tpu.dimension_semantics<parallel>], iteration_bounds = array<i64: 2>, scalar_prefetch = 0 : i64, scratch_operands = 0 : i64, tpu.core_type = #tpu.core_type<tc>, window_params = [{transform_indices = @transform_0, window_bounds = array<i64: 1, 8, 326>}, {pipeline_mode = #tpu.pipeline_mode<synchronous>, transform_indices = @transform_1, window_bounds = array<i64: 9, 8, 8>}, {pipeline_mode = #tpu.pipeline_mode<synchronous>, transform_indices = @transform_2, window_bounds = array<i64: 8, 1>}, {pipeline_mode = #tpu.pipeline_mode<synchronous>, transform_indices = @transform_3, window_bounds = array<i64: 269, 102>}, {pipeline_mode = #tpu.pipeline_mode<synchronous>, transform_indices = @transform_4, window_bounds = array<i64: 9, 8, 8>}, {pipeline_mode = #tpu.pipeline_mode<synchronous>, transform_indices = @transform_5, window_bounds = array<i64: 8, 1>}, {pipeline_mode = #tpu.pipeline_mode<synchronous>, transform_indices = @transform_6, window_bounds = array<i64: 69, 16>}, {transform_indices = @transform_7, window_bounds = array<i64: 1, 8, 16>}]} {
    %c0 = arith.constant 0 : index
    %c0_0 = arith.constant 0 : index
    %c0_1 = arith.constant 0 : index
    %0 = vector.load %arg1[%c0, %c0_0, %c0_1] : memref<1x8x326xf32, #tpu.memory_space<vmem>>, vector<1x8x326xf32>
    %1 = vector.shape_cast %0 : vector<1x8x326xf32> to vector<8x326xf32>
    %c0_2 = arith.constant 0 : index
    %c0_3 = arith.constant 0 : index
    %c0_4 = arith.constant 0 : index
    %2 = vector.load %arg2[%c0_2, %c0_3, %c0_4] : memref<9x8x8xf32, #tpu.memory_space<vmem>>, vector<1x8x8xf32>
    %3 = vector.shape_cast %2 : vector<1x8x8xf32> to vector<8x8xf32>
    %4 = vector.extract_strided_slice %1 {offsets = [0, 0], sizes = [8, 288], strides = [1, 1]} : vector<8x326xf32> to vector<8x288xf32>
    %cst = arith.constant dense<0.000000e+00> : vector<8x288xf32>
    %5 = tpu.matmul %3, %4, %cst {dimension_numbers = #tpu.dot_dimension_numbers<[1], [0], [0], [1], [0, 0, 1, 1], [], []>} : vector<8x8xf32>, vector<8x288xf32>, vector<8x288xf32> -> vector<8x288xf32>
    %c1 = arith.constant 1 : index
    %c0_5 = arith.constant 0 : index
    %c0_6 = arith.constant 0 : index
    %6 = vector.load %arg2[%c1, %c0_5, %c0_6] : memref<9x8x8xf32, #tpu.memory_space<vmem>>, vector<1x8x8xf32>
    %7 = vector.shape_cast %6 : vector<1x8x8xf32> to vector<8x8xf32>
    %8 = vector.extract_strided_slice %1 {offsets = [0, 1], sizes = [8, 288], strides = [1, 1]} : vector<8x326xf32> to vector<8x288xf32>
    %cst_7 = arith.constant dense<0.000000e+00> : vector<8x288xf32>
    %9 = tpu.matmul %7, %8, %cst_7 {dimension_numbers = #tpu.dot_dimension_numbers<[1], [0], [0], [1], [0, 0, 1, 1], [], []>} : vector<8x8xf32>, vector<8x288xf32>, vector<8x288xf32> -> vector<8x288xf32>
    %10 = arith.addf %5, %9 : vector<8x288xf32>
    %c2 = arith.constant 2 : index
    %c0_8 = arith.constant 0 : index
    %c0_9 = arith.constant 0 : index
    %11 = vector.load %arg2[%c2, %c0_8, %c0_9] : memref<9x8x8xf32, #tpu.memory_space<vmem>>, vector<1x8x8xf32>
    %12 = vector.shape_cast %11 : vector<1x8x8xf32> to vector<8x8xf32>
    %13 = vector.extract_strided_slice %1 {offsets = [0, 2], sizes = [8, 288], strides = [1, 1]} : vector<8x326xf32> to vector<8x288xf32>
    %cst_10 = arith.constant dense<0.000000e+00> : vector<8x288xf32>
    %14 = tpu.matmul %12, %13, %cst_10 {dimension_numbers = #tpu.dot_dimension_numbers<[1], [0], [0], [1], [0, 0, 1, 1], [], []>} : vector<8x8xf32>, vector<8x288xf32>, vector<8x288xf32> -> vector<8x288xf32>
    %15 = arith.addf %10, %14 : vector<8x288xf32>
    %c3 = arith.constant 3 : index
    %c0_11 = arith.constant 0 : index
    %c0_12 = arith.constant 0 : index
    %16 = vector.load %arg2[%c3, %c0_11, %c0_12] : memref<9x8x8xf32, #tpu.memory_space<vmem>>, vector<1x8x8xf32>
    %17 = vector.shape_cast %16 : vector<1x8x8xf32> to vector<8x8xf32>
    %18 = vector.extract_strided_slice %1 {offsets = [0, 18], sizes = [8, 288], strides = [1, 1]} : vector<8x326xf32> to vector<8x288xf32>
    %cst_13 = arith.constant dense<0.000000e+00> : vector<8x288xf32>
    %19 = tpu.matmul %17, %18, %cst_13 {dimension_numbers = #tpu.dot_dimension_numbers<[1], [0], [0], [1], [0, 0, 1, 1], [], []>} : vector<8x8xf32>, vector<8x288xf32>, vector<8x288xf32> -> vector<8x288xf32>
    %20 = arith.addf %15, %19 : vector<8x288xf32>
    %c4 = arith.constant 4 : index
    %c0_14 = arith.constant 0 : index
    %c0_15 = arith.constant 0 : index
    %21 = vector.load %arg2[%c4, %c0_14, %c0_15] : memref<9x8x8xf32, #tpu.memory_space<vmem>>, vector<1x8x8xf32>
    %22 = vector.shape_cast %21 : vector<1x8x8xf32> to vector<8x8xf32>
    %23 = vector.extract_strided_slice %1 {offsets = [0, 19], sizes = [8, 288], strides = [1, 1]} : vector<8x326xf32> to vector<8x288xf32>
    %cst_16 = arith.constant dense<0.000000e+00> : vector<8x288xf32>
    %24 = tpu.matmul %22, %23, %cst_16 {dimension_numbers = #tpu.dot_dimension_numbers<[1], [0], [0], [1], [0, 0, 1, 1], [], []>} : vector<8x8xf32>, vector<8x288xf32>, vector<8x288xf32> -> vector<8x288xf32>
    %25 = arith.addf %20, %24 : vector<8x288xf32>
    %c5 = arith.constant 5 : index
    %c0_17 = arith.constant 0 : index
    %c0_18 = arith.constant 0 : index
    %26 = vector.load %arg2[%c5, %c0_17, %c0_18] : memref<9x8x8xf32, #tpu.memory_space<vmem>>, vector<1x8x8xf32>
    %27 = vector.shape_cast %26 : vector<1x8x8xf32> to vector<8x8xf32>
    %28 = vector.extract_strided_slice %1 {offsets = [0, 20], sizes = [8, 288], strides = [1, 1]} : vector<8x326xf32> to vector<8x288xf32>
    %cst_19 = arith.constant dense<0.000000e+00> : vector<8x288xf32>
    %29 = tpu.matmul %27, %28, %cst_19 {dimension_numbers = #tpu.dot_dimension_numbers<[1], [0], [0], [1], [0, 0, 1, 1], [], []>} : vector<8x8xf32>, vector<8x288xf32>, vector<8x288xf32> -> vector<8x288xf32>
    %30 = arith.addf %25, %29 : vector<8x288xf32>
    %c6 = arith.constant 6 : index
    %c0_20 = arith.constant 0 : index
    %c0_21 = arith.constant 0 : index
    %31 = vector.load %arg2[%c6, %c0_20, %c0_21] : memref<9x8x8xf32, #tpu.memory_space<vmem>>, vector<1x8x8xf32>
    %32 = vector.shape_cast %31 : vector<1x8x8xf32> to vector<8x8xf32>
    %33 = vector.extract_strided_slice %1 {offsets = [0, 36], sizes = [8, 288], strides = [1, 1]} : vector<8x326xf32> to vector<8x288xf32>
    %cst_22 = arith.constant dense<0.000000e+00> : vector<8x288xf32>
    %34 = tpu.matmul %32, %33, %cst_22 {dimension_numbers = #tpu.dot_dimension_numbers<[1], [0], [0], [1], [0, 0, 1, 1], [], []>} : vector<8x8xf32>, vector<8x288xf32>, vector<8x288xf32> -> vector<8x288xf32>
    %35 = arith.addf %30, %34 : vector<8x288xf32>
    %c7 = arith.constant 7 : index
    %c0_23 = arith.constant 0 : index
    %c0_24 = arith.constant 0 : index
    %36 = vector.load %arg2[%c7, %c0_23, %c0_24] : memref<9x8x8xf32, #tpu.memory_space<vmem>>, vector<1x8x8xf32>
    %37 = vector.shape_cast %36 : vector<1x8x8xf32> to vector<8x8xf32>
    %38 = vector.extract_strided_slice %1 {offsets = [0, 37], sizes = [8, 288], strides = [1, 1]} : vector<8x326xf32> to vector<8x288xf32>
    %cst_25 = arith.constant dense<0.000000e+00> : vector<8x288xf32>
    %39 = tpu.matmul %37, %38, %cst_25 {dimension_numbers = #tpu.dot_dimension_numbers<[1], [0], [0], [1], [0, 0, 1, 1], [], []>} : vector<8x8xf32>, vector<8x288xf32>, vector<8x288xf32> -> vector<8x288xf32>
    %40 = arith.addf %35, %39 : vector<8x288xf32>
    %c8 = arith.constant 8 : index
    %c0_26 = arith.constant 0 : index
    %c0_27 = arith.constant 0 : index
    %41 = vector.load %arg2[%c8, %c0_26, %c0_27] : memref<9x8x8xf32, #tpu.memory_space<vmem>>, vector<1x8x8xf32>
    %42 = vector.shape_cast %41 : vector<1x8x8xf32> to vector<8x8xf32>
    %43 = vector.extract_strided_slice %1 {offsets = [0, 38], sizes = [8, 288], strides = [1, 1]} : vector<8x326xf32> to vector<8x288xf32>
    %cst_28 = arith.constant dense<0.000000e+00> : vector<8x288xf32>
    %44 = tpu.matmul %42, %43, %cst_28 {dimension_numbers = #tpu.dot_dimension_numbers<[1], [0], [0], [1], [0, 0, 1, 1], [], []>} : vector<8x8xf32>, vector<8x288xf32>, vector<8x288xf32> -> vector<8x288xf32>
    %45 = arith.addf %40, %44 : vector<8x288xf32>
    %c0_29 = arith.constant 0 : index
    %c0_30 = arith.constant 0 : index
    %46 = vector.load %arg3[%c0_29, %c0_30] : memref<8x1xf32, #tpu.memory_space<vmem>>, vector<8x1xf32>
    %47 = vector.broadcast %46 : vector<8x1xf32> to vector<8x288xf32>
    %48 = arith.addf %45, %47 : vector<8x288xf32>
    %cst_31 = arith.constant 0.000000e+00 : f32
    %49 = vector.broadcast %cst_31 : f32 to vector<8x288xf32>
    %50 = arith.maximumf %48, %49 : vector<8x288xf32>
    %51 = vector.extract_strided_slice %50 {offsets = [0, 0], sizes = [8, 270], strides = [1, 1]} : vector<8x288xf32> to vector<8x270xf32>
    %52 = vector.extract_strided_slice %50 {offsets = [0, 18], sizes = [8, 270], strides = [1, 1]} : vector<8x288xf32> to vector<8x270xf32>
    %53 = arith.maximumf %51, %52 : vector<8x270xf32>
    %54 = vector.extract_strided_slice %53 {offsets = [0, 0], sizes = [8, 269], strides = [1, 1]} : vector<8x270xf32> to vector<8x269xf32>
    %55 = vector.extract_strided_slice %53 {offsets = [0, 1], sizes = [8, 269], strides = [1, 1]} : vector<8x270xf32> to vector<8x269xf32>
    %56 = arith.maximumf %54, %55 : vector<8x269xf32>
    %c0_32 = arith.constant 0 : index
    %c0_33 = arith.constant 0 : index
    %57 = vector.load %arg4[%c0_32, %c0_33] : memref<269x102xf32, #tpu.memory_space<vmem>>, vector<269x102xf32>
    %cst_34 = arith.constant dense<0.000000e+00> : vector<8x102xf32>
    %58 = tpu.matmul %56, %57, %cst_34 {dimension_numbers = #tpu.dot_dimension_numbers<[1], [0], [0], [1], [0, 0, 1, 1], [], []>} : vector<8x269xf32>, vector<269x102xf32>, vector<8x102xf32> -> vector<8x102xf32>
    %c0_35 = arith.constant 0 : index
    %c0_36 = arith.constant 0 : index
    %c0_37 = arith.constant 0 : index
    %59 = vector.load %arg5[%c0_35, %c0_36, %c0_37] : memref<9x8x8xf32, #tpu.memory_space<vmem>>, vector<1x8x8xf32>
    %60 = vector.shape_cast %59 : vector<1x8x8xf32> to vector<8x8xf32>
    %61 = vector.extract_strided_slice %58 {offsets = [0, 0], sizes = [8, 80], strides = [1, 1]} : vector<8x102xf32> to vector<8x80xf32>
    %cst_38 = arith.constant dense<0.000000e+00> : vector<8x80xf32>
    %62 = tpu.matmul %60, %61, %cst_38 {dimension_numbers = #tpu.dot_dimension_numbers<[1], [0], [0], [1], [0, 0, 1, 1], [], []>} : vector<8x8xf32>, vector<8x80xf32>, vector<8x80xf32> -> vector<8x80xf32>
    %c1_39 = arith.constant 1 : index
    %c0_40 = arith.constant 0 : index
    %c0_41 = arith.constant 0 : index
    %63 = vector.load %arg5[%c1_39, %c0_40, %c0_41] : memref<9x8x8xf32, #tpu.memory_space<vmem>>, vector<1x8x8xf32>
    %64 = vector.shape_cast %63 : vector<1x8x8xf32> to vector<8x8xf32>
    %65 = vector.extract_strided_slice %58 {offsets = [0, 1], sizes = [8, 80], strides = [1, 1]} : vector<8x102xf32> to vector<8x80xf32>
    %cst_42 = arith.constant dense<0.000000e+00> : vector<8x80xf32>
    %66 = tpu.matmul %64, %65, %cst_42 {dimension_numbers = #tpu.dot_dimension_numbers<[1], [0], [0], [1], [0, 0, 1, 1], [], []>} : vector<8x8xf32>, vector<8x80xf32>, vector<8x80xf32> -> vector<8x80xf32>
    %67 = arith.addf %62, %66 : vector<8x80xf32>
    %c2_43 = arith.constant 2 : index
    %c0_44 = arith.constant 0 : index
    %c0_45 = arith.constant 0 : index
    %68 = vector.load %arg5[%c2_43, %c0_44, %c0_45] : memref<9x8x8xf32, #tpu.memory_space<vmem>>, vector<1x8x8xf32>
    %69 = vector.shape_cast %68 : vector<1x8x8xf32> to vector<8x8xf32>
    %70 = vector.extract_strided_slice %58 {offsets = [0, 2], sizes = [8, 80], strides = [1, 1]} : vector<8x102xf32> to vector<8x80xf32>
    %cst_46 = arith.constant dense<0.000000e+00> : vector<8x80xf32>
    %71 = tpu.matmul %69, %70, %cst_46 {dimension_numbers = #tpu.dot_dimension_numbers<[1], [0], [0], [1], [0, 0, 1, 1], [], []>} : vector<8x8xf32>, vector<8x80xf32>, vector<8x80xf32> -> vector<8x80xf32>
    %72 = arith.addf %67, %71 : vector<8x80xf32>
    %c3_47 = arith.constant 3 : index
    %c0_48 = arith.constant 0 : index
    %c0_49 = arith.constant 0 : index
    %73 = vector.load %arg5[%c3_47, %c0_48, %c0_49] : memref<9x8x8xf32, #tpu.memory_space<vmem>>, vector<1x8x8xf32>
    %74 = vector.shape_cast %73 : vector<1x8x8xf32> to vector<8x8xf32>
    %75 = vector.extract_strided_slice %58 {offsets = [0, 10], sizes = [8, 80], strides = [1, 1]} : vector<8x102xf32> to vector<8x80xf32>
    %cst_50 = arith.constant dense<0.000000e+00> : vector<8x80xf32>
    %76 = tpu.matmul %74, %75, %cst_50 {dimension_numbers = #tpu.dot_dimension_numbers<[1], [0], [0], [1], [0, 0, 1, 1], [], []>} : vector<8x8xf32>, vector<8x80xf32>, vector<8x80xf32> -> vector<8x80xf32>
    %77 = arith.addf %72, %76 : vector<8x80xf32>
    %c4_51 = arith.constant 4 : index
    %c0_52 = arith.constant 0 : index
    %c0_53 = arith.constant 0 : index
    %78 = vector.load %arg5[%c4_51, %c0_52, %c0_53] : memref<9x8x8xf32, #tpu.memory_space<vmem>>, vector<1x8x8xf32>
    %79 = vector.shape_cast %78 : vector<1x8x8xf32> to vector<8x8xf32>
    %80 = vector.extract_strided_slice %58 {offsets = [0, 11], sizes = [8, 80], strides = [1, 1]} : vector<8x102xf32> to vector<8x80xf32>
    %cst_54 = arith.constant dense<0.000000e+00> : vector<8x80xf32>
    %81 = tpu.matmul %79, %80, %cst_54 {dimension_numbers = #tpu.dot_dimension_numbers<[1], [0], [0], [1], [0, 0, 1, 1], [], []>} : vector<8x8xf32>, vector<8x80xf32>, vector<8x80xf32> -> vector<8x80xf32>
    %82 = arith.addf %77, %81 : vector<8x80xf32>
    %c5_55 = arith.constant 5 : index
    %c0_56 = arith.constant 0 : index
    %c0_57 = arith.constant 0 : index
    %83 = vector.load %arg5[%c5_55, %c0_56, %c0_57] : memref<9x8x8xf32, #tpu.memory_space<vmem>>, vector<1x8x8xf32>
    %84 = vector.shape_cast %83 : vector<1x8x8xf32> to vector<8x8xf32>
    %85 = vector.extract_strided_slice %58 {offsets = [0, 12], sizes = [8, 80], strides = [1, 1]} : vector<8x102xf32> to vector<8x80xf32>
    %cst_58 = arith.constant dense<0.000000e+00> : vector<8x80xf32>
    %86 = tpu.matmul %84, %85, %cst_58 {dimension_numbers = #tpu.dot_dimension_numbers<[1], [0], [0], [1], [0, 0, 1, 1], [], []>} : vector<8x8xf32>, vector<8x80xf32>, vector<8x80xf32> -> vector<8x80xf32>
    %87 = arith.addf %82, %86 : vector<8x80xf32>
    %c6_59 = arith.constant 6 : index
    %c0_60 = arith.constant 0 : index
    %c0_61 = arith.constant 0 : index
    %88 = vector.load %arg5[%c6_59, %c0_60, %c0_61] : memref<9x8x8xf32, #tpu.memory_space<vmem>>, vector<1x8x8xf32>
    %89 = vector.shape_cast %88 : vector<1x8x8xf32> to vector<8x8xf32>
    %90 = vector.extract_strided_slice %58 {offsets = [0, 20], sizes = [8, 80], strides = [1, 1]} : vector<8x102xf32> to vector<8x80xf32>
    %cst_62 = arith.constant dense<0.000000e+00> : vector<8x80xf32>
    %91 = tpu.matmul %89, %90, %cst_62 {dimension_numbers = #tpu.dot_dimension_numbers<[1], [0], [0], [1], [0, 0, 1, 1], [], []>} : vector<8x8xf32>, vector<8x80xf32>, vector<8x80xf32> -> vector<8x80xf32>
    %92 = arith.addf %87, %91 : vector<8x80xf32>
    %c7_63 = arith.constant 7 : index
    %c0_64 = arith.constant 0 : index
    %c0_65 = arith.constant 0 : index
    %93 = vector.load %arg5[%c7_63, %c0_64, %c0_65] : memref<9x8x8xf32, #tpu.memory_space<vmem>>, vector<1x8x8xf32>
    %94 = vector.shape_cast %93 : vector<1x8x8xf32> to vector<8x8xf32>
    %95 = vector.extract_strided_slice %58 {offsets = [0, 21], sizes = [8, 80], strides = [1, 1]} : vector<8x102xf32> to vector<8x80xf32>
    %cst_66 = arith.constant dense<0.000000e+00> : vector<8x80xf32>
    %96 = tpu.matmul %94, %95, %cst_66 {dimension_numbers = #tpu.dot_dimension_numbers<[1], [0], [0], [1], [0, 0, 1, 1], [], []>} : vector<8x8xf32>, vector<8x80xf32>, vector<8x80xf32> -> vector<8x80xf32>
    %97 = arith.addf %92, %96 : vector<8x80xf32>
    %c8_67 = arith.constant 8 : index
    %c0_68 = arith.constant 0 : index
    %c0_69 = arith.constant 0 : index
    %98 = vector.load %arg5[%c8_67, %c0_68, %c0_69] : memref<9x8x8xf32, #tpu.memory_space<vmem>>, vector<1x8x8xf32>
    %99 = vector.shape_cast %98 : vector<1x8x8xf32> to vector<8x8xf32>
    %100 = vector.extract_strided_slice %58 {offsets = [0, 22], sizes = [8, 80], strides = [1, 1]} : vector<8x102xf32> to vector<8x80xf32>
    %cst_70 = arith.constant dense<0.000000e+00> : vector<8x80xf32>
    %101 = tpu.matmul %99, %100, %cst_70 {dimension_numbers = #tpu.dot_dimension_numbers<[1], [0], [0], [1], [0, 0, 1, 1], [], []>} : vector<8x8xf32>, vector<8x80xf32>, vector<8x80xf32> -> vector<8x80xf32>
    %102 = arith.addf %97, %101 : vector<8x80xf32>
    %c0_71 = arith.constant 0 : index
    %c0_72 = arith.constant 0 : index
    %103 = vector.load %arg6[%c0_71, %c0_72] : memref<8x1xf32, #tpu.memory_space<vmem>>, vector<8x1xf32>
    %104 = vector.broadcast %103 : vector<8x1xf32> to vector<8x80xf32>
    %105 = arith.addf %102, %104 : vector<8x80xf32>
    %cst_73 = arith.constant 0.000000e+00 : f32
    %106 = vector.broadcast %cst_73 : f32 to vector<8x80xf32>
    %107 = arith.maximumf %105, %106 : vector<8x80xf32>
    %108 = vector.extract_strided_slice %107 {offsets = [0, 0], sizes = [8, 70], strides = [1, 1]} : vector<8x80xf32> to vector<8x70xf32>
    %109 = vector.extract_strided_slice %107 {offsets = [0, 10], sizes = [8, 70], strides = [1, 1]} : vector<8x80xf32> to vector<8x70xf32>
    %110 = arith.maximumf %108, %109 : vector<8x70xf32>
    %111 = vector.extract_strided_slice %110 {offsets = [0, 0], sizes = [8, 69], strides = [1, 1]} : vector<8x70xf32> to vector<8x69xf32>
    %112 = vector.extract_strided_slice %110 {offsets = [0, 1], sizes = [8, 69], strides = [1, 1]} : vector<8x70xf32> to vector<8x69xf32>
    %113 = arith.maximumf %111, %112 : vector<8x69xf32>
    %c0_74 = arith.constant 0 : index
    %c0_75 = arith.constant 0 : index
    %114 = vector.load %arg7[%c0_74, %c0_75] : memref<69x16xf32, #tpu.memory_space<vmem>>, vector<69x16xf32>
    %cst_76 = arith.constant dense<0.000000e+00> : vector<8x16xf32>
    %115 = tpu.matmul %113, %114, %cst_76 {dimension_numbers = #tpu.dot_dimension_numbers<[1], [0], [0], [1], [0, 0, 1, 1], [], []>} : vector<8x69xf32>, vector<69x16xf32>, vector<8x16xf32> -> vector<8x16xf32>
    %c0_77 = arith.constant 0 : index
    %c0_78 = arith.constant 0 : index
    %c0_79 = arith.constant 0 : index
    %116 = vector.load %arg8[%c0_77, %c0_78, %c0_79] : memref<1x8x16xf32, #tpu.memory_space<vmem>>, vector<1x8x16xf32>
    %117 = vector.shape_cast %116 : vector<1x8x16xf32> to vector<8x16xf32>
    %118 = vector.shape_cast %115 : vector<8x16xf32> to vector<1x8x16xf32>
    tpu.vector_store %arg8[%c0_77, %c0_78, %c0_79], %118 {strides = array<i32>} : memref<1x8x16xf32, #tpu.memory_space<vmem>>, vector<1x8x16xf32>,
    return
  }
  func.func @transform_0(%arg0: i32) -> (i32, i32, i32) {
    %c0_i32 = arith.constant 0 : i32
    %c0_i32_0 = arith.constant 0 : i32
    %c0_i32_1 = arith.constant 0 : i32
    return %arg0, %c0_i32, %c0_i32_0 : i32, i32, i32
  }
  func.func @transform_1(%arg0: i32) -> (i32, i32, i32) {
    %c0_i32 = arith.constant 0 : i32
    %c0_i32_0 = arith.constant 0 : i32
    %c0_i32_1 = arith.constant 0 : i32
    %c0_i32_2 = arith.constant 0 : i32
    return %c0_i32, %c0_i32_0, %c0_i32_1 : i32, i32, i32
  }
  func.func @transform_2(%arg0: i32) -> (i32, i32) {
    %c0_i32 = arith.constant 0 : i32
    %c0_i32_0 = arith.constant 0 : i32
    %c0_i32_1 = arith.constant 0 : i32
    return %c0_i32, %c0_i32_0 : i32, i32
  }
  func.func @transform_3(%arg0: i32) -> (i32, i32) {
    %c0_i32 = arith.constant 0 : i32
    %c0_i32_0 = arith.constant 0 : i32
    %c0_i32_1 = arith.constant 0 : i32
    return %c0_i32, %c0_i32_0 : i32, i32
  }
  func.func @transform_4(%arg0: i32) -> (i32, i32, i32) {
    %c0_i32 = arith.constant 0 : i32
    %c0_i32_0 = arith.constant 0 : i32
    %c0_i32_1 = arith.constant 0 : i32
    %c0_i32_2 = arith.constant 0 : i32
    return %c0_i32, %c0_i32_0, %c0_i32_1 : i32, i32, i32
  }
  func.func @transform_5(%arg0: i32) -> (i32, i32) {
    %c0_i32 = arith.constant 0 : i32
    %c0_i32_0 = arith.constant 0 : i32
    %c0_i32_1 = arith.constant 0 : i32
    return %c0_i32, %c0_i32_0 : i32, i32
  }
  func.func @transform_6(%arg0: i32) -> (i32, i32) {
    %c0_i32 = arith.constant 0 : i32
    %c0_i32_0 = arith.constant 0 : i32
    %c0_i32_1 = arith.constant 0 : i32
    return %c0_i32, %c0_i32_0 : i32, i32
  }
  func.func @transform_7(%arg0: i32) -> (i32, i32, i32) {
    %c0_i32 = arith.constant 0 : i32
    %c0_i32_0 = arith.constant 0 : i32
    %c0_i32_1 = arith.constant 0 : i32
    return %arg0, %c0_i32, %c0_i32_0 : i32, i32, i32
  }
}

</mosaic_0001>

<bundles_post_ra>
// kernel: conv_interp_forward.1
= control target key start
LH: loop header
LB: loop body
LE: loop exit
PB: predicated region body
PF: predicated region fallthrough
CT: control target
= control target key end

     0   :  { %s3165_s24 = smov 0   ;;  %s3559_s0 = inlined_call_operand.vmem [shape: f32[2,8,326], index: 0, kind: input, shape index: {}]   ;;  %s3560_s1 = inlined_call_operand.vmem [shape: f32[9,8,8], index: 1, kind: input, shape index: {}]   ;;  %s3561_s2 = inlined_call_operand.vmem [shape: f32[8,1], index: 2, kind: input, shape index: {}]   ;;  %s3562_s3 = inlined_call_operand.vmem [shape: f32[269,102], index: 3, kind: input, shape index: {}]   ;;  %s3563_s4 = inlined_call_operand.vmem [shape: f32[9,8,8], index: 4, kind: input, shape index: {}]   ;;  %s3564_s5 = inlined_call_operand.vmem [shape: f32[8,1], index: 5, kind: input, shape index: {}]   ;;  %s3565_s6 = inlined_call_operand.vmem [shape: f32[69,16], index: 6, kind: input, shape index: {}]   ;;  %s3566_s7 = inlined_call_operand.vmem [shape: f32[2,8,16], index: 7, kind: output, shape index: {}]  }
   0x1 LB: > { %s2807_s25 = sadd.s32 4294967295, %s3107_s24   ;;  %p2811_p0 = scmp.ge.s32.totalorder %s3107_s24, 1  ;;  %s3107_s24 = sphi %s3165_s24, %s17_s24  }
   0x2   : > { %p237_p1 = scmp.lt.s32.totalorder %s3107_s24, 3 }
   0x4   : > { %p238_p2 = pnand %p2811_p0, %p237_p1 }
   0x5   : > { %p268_p3 = scmp.lt.s32.totalorder (!%p238_p2), %s2807_s25, 1  ;;  %s3110_s30 = smov (!%p238_p2), 127  }
   0x6   : > { %241 = sbr.rel (%p238_p2) target bundleno = 1597 (0x63d), region = 48  ;;  %s3111_s8 = smov (!%p238_p2), 126  }
   0x7   : > { %s3112_s9 = smov (!%p238_p2), 110   ;;  %s3113_s10 = smov (!%p238_p2), 109  }
   0x8   : > { %s3114_s11 = smov (!%p238_p2), 108   ;;  %s3115_s12 = smov (!%p238_p2), 92  }
   0x9   : > { %s3117_s13 = smov (!%p238_p2), 91   ;;  %s3118_s14 = smov (!%p238_p2), 90  }
   0xa   : > { %s3120_s15 = smov (!%p238_p2), 117   ;;  %s3121_s16 = smov (!%p238_p2), 118  }
   0xb   : > { %v3109_v0 = vmov 0.0   ;;  %s3568_s25 = smov (!%p268_p3, %s2807_s25), 1  ;;  %v3116_v4 = vmov 0   ;;  %v1714_v5 = vld [vmem:[%s3561_s2] sm:$0xff]  ;;  %vm292_vm0 = vcmask 1039360   ;;  %v2814_v11 = vld [vmem:[%s3560_s1 + $0x8] sm:$0xff] }
   0xc   : > { %366 = vmatprep.mubr.f32.mxu1 %v3109_v0  ;;  %668 = vmatprep.mubr.f32.mxu0 %v3109_v0  ;;  %s3065_s26 = smul.u32 24, %s3568_s25  ;;  %vm298_vm1 = vcmask 64512   ;;  %vm595_vm2 = vcmask 1031168   ;;  %vm3119_vm3 = vmmov 0   ;;  %v2819_v17 = vld [vmem:[%s3560_s1 + $0x10] sm:$0xff]  ;;  %vm756_vm4 = vcmask 900096  }
   0xd   : > { %3090 = vset.pattern.permute.xlu0 %v3116_v4  ;;  %v280_v21 = vld [vmem:[%s3560_s1] sm:$0xff]  ;;  %v2822_v24 = vld [vmem:[%s3560_s1 + $0x18] sm:$0xff]  ;;  %vm917_vm5 = vcmask 891904   ;;  %vm1078_vm6 = vcmask 883712   ;;  %v2828_v36 = vld [vmem:[%s3560_s1 + $0x28] sm:$0xff]  ;;  %vm1239_vm7 = vcmask 752640  }
   0xe   : > { %s272_s29 = scalar_lea.vmem %s3559_s0, %s3065_s26  ;;  %v2825_v30 = vld [vmem:[%s3560_s1 + $0x20] sm:$0xff]  ;;  %v2831_v42 = vld [vmem:[%s3560_s1 + $0x30] sm:$0xff]  ;;  %vm1400_vm8 = vcmask 744448   ;;  %v2834_v48 = vld [vmem:[%s3560_s1 + $0x38] sm:$0xff]  ;;  %vm1561_vm9 = vcmask 736256   ;;  %vm1798_vm10 = vcmask 1044480  }
   0xf   : > { %v278_v1 = vld [vmem:[%s272_s29 + $0x8] sm:$0xff]  ;;  %v3181_v2 = vld [vmem:[%s272_s29] sm:$0xff]  ;;  %v3186_v3 = vld [vmem:[%s272_s29 + $0x10] sm:$0xff]  ;;  %vm1794_vm11 = vcmask 105472   ;;  %s3122_s17 = smov 116   ;;  %s3123_s18 = smov 106  }
  0x10   : > { %288 = vrot.lane.b32.xlu0 %v278_v1, %s3110_s30  ;;  %286 = vrot.lane.b32.xlu1 %v3181_v2, %s3110_s30  ;;  %v2837_v54 = vld [vmem:[%s3560_s1 + $0x40] sm:$0xff]  ;;  %s3124_s19 = smov 107   ;;  %vm2675_vm12 = vcmask 564224   ;;  %vm2752_vm13 = vcmask 130048  }
  0x14   : > { %290 = vrot.lane.b32.xlu0 %v3186_v3, %s3110_s30  ;;  %591 = vrot.lane.b32.xlu1 %v278_v1, %s3111_s8 }
  0x18   : > { %593 = vrot.lane.b32.xlu0 %v3186_v3, %s3111_s8  ;;  %589 = vrot.lane.b32.xlu1 %v3181_v2, %s3111_s8 }
  0x1c   : > { %752 = vrot.lane.b32.xlu0 %v278_v1, %s3112_s9  ;;  %754 = vrot.lane.b32.xlu1 %v3186_v3, %s3112_s9 }
  0x20   : > { %750 = vrot.lane.b32.xlu0 %v3181_v2, %s3112_s9  ;;  %913 = vrot.lane.b32.xlu1 %v278_v1, %s3113_s10 }
  0x24   : > { %915 = vrot.lane.b32.xlu0 %v3186_v3, %s3113_s10  ;;  %911 = vrot.lane.b32.xlu1 %v3181_v2, %s3113_s10 }
  0x28   : > { %1074 = vrot.lane.b32.xlu0 %v278_v1, %s3114_s11  ;;  %1076 = vrot.lane.b32.xlu1 %v3186_v3, %s3114_s11 }
  0x2c   : > { %1072 = vrot.lane.b32.xlu0 %v3181_v2, %s3114_s11  ;;  %1235 = vrot.lane.b32.xlu1 %v278_v1, %s3115_s12 }
  0x30   : > { %1237 = vrot.lane.b32.xlu0 %v3186_v3, %s3115_s12  ;;  %1233 = vrot.lane.b32.xlu1 %v3181_v2, %s3115_s12 }
  0x34   : > { %1396 = vrot.lane.b32.xlu0 %v278_v1, %s3117_s13  ;;  %1398 = vrot.lane.b32.xlu1 %v3186_v3, %s3117_s13 }
  0x38   : > { %1394 = vrot.lane.b32.xlu0 %v3181_v2, %s3117_s13  ;;  %1557 = vrot.lane.b32.xlu1 %v278_v1, %s3118_s14 }
  0x3c   : > { %1559 = vrot.lane.b32.xlu0 %v3186_v3, %s3118_s14  ;;  %1555 = vrot.lane.b32.xlu1 %v3181_v2, %s3118_s14 }
  0x40   : > { %1717 = vperm.xlu0 %3090, %v1714_v5  }
  0x82   : > { %v289_v6 = vpop.permute.xlu0 %288  ;;  %v287_v7 = vpop.permute.xlu1 %286 }
  0x83   : > { %v293_v12 = vsel %vm292_vm0, %v287_v7, %v289_v6 }
  0x86   : > { %v291_v8 = vpop.permute.xlu0 %290  ;;  %v592_v9 = vpop.permute.xlu1 %591 }
  0x87   : > { %v294_v10 = vsel %vm292_vm0, %v289_v6, %v291_v8 }
  0x88   : > { %332 = vmatprep.subr.mxu1 %v294_v10 }
  0x89   : > { %333 = vmatpush1.msra.mxu1 %v293_v12 }
  0x8a   : > { %v594_v13 = vpop.permute.xlu0 %593  ;;  %2815 = vmatmul.mubr.msk.f32.vlgmr.msra.gmra.mxu1 %vm298_vm1, %v2814_v11  ;;  %2947 = vmatprep.subr.mxu1 %v3109_v0  ;;  %v590_v14 = vpop.permute.xlu1 %589 }
  0x8b   : > { %2948 = vmatpush3.msra.mxu1 %v291_v8  ;;  %v597_v15 = vsel %vm595_vm2, %v592_v9, %v594_v13  ;;  %2949 = vmatprep.mubr.msk.f32.mxu1 %vm3119_vm3, %v3109_v0  ;;  %v596_v16 = vsel %vm595_vm2, %v590_v14, %v592_v9 }
  0x8c   : > { %634 = vmatprep.subr.mxu0 %v597_v15  ;;  %476 = vmatprep.subr.mxu1 %v278_v1 }
  0x8d   : > { %635 = vmatpush1.msra.mxu0 %v596_v16 }
  0x8e   : > { %v753_v18 = vpop.permute.xlu0 %752  ;;  %2950 = vmatmul.mubr.msk.f32.vlgmr.msra.gmra.mxu1 %vm298_vm1, %v2814_v11  ;;  %v755_v19 = vpop.permute.xlu1 %754  ;;  %2820 = vmatmul.mubr.msk.f32.vlgmr.msra.gmra.mxu0 %vm298_vm1, %v2819_v17 }
  0x8f   : > { %v758_v20 = vsel %vm756_vm4, %v753_v18, %v755_v19  ;;  %477 = vmatpush1.msra.mxu1 %v3181_v2  ;;  %510 = vmatprep.mubr.f32.mxu1 %v3109_v0 }
  0x90   : > { %795 = vmatprep.subr.mxu0 %v758_v20  ;;  %2952 = vmatprep.subr.mxu1 %v3109_v0 }
  0x91   : > { %829 = vmatprep.mubr.f32.mxu0 %v3109_v0 }
  0x92   : > { %v751_v22 = vpop.permute.xlu0 %750  ;;  %2817 = vmatmul.mubr.msk.f32.vlgmr.msra.gmra.mxu1 %vm298_vm1, %v280_v21  ;;  %v914_v23 = vpop.permute.xlu1 %913 }
  0x93   : > { %v757_v25 = vsel %vm756_vm4, %v751_v22, %v753_v18  ;;  %2953 = vmatpush3.msra.mxu1 %v3186_v3  ;;  %2954 = vmatprep.mubr.msk.f32.mxu1 %vm3119_vm3, %v3109_v0 }
  0x94   : > { %796 = vmatpush1.msra.mxu0 %v757_v25  ;;  %2957 = vmatprep.subr.mxu1 %v3109_v0 }
  0x95   : > { %2823 = vmatmul.mubr.msk.f32.vlgmr.msra.gmra.mxu0 %vm298_vm1, %v2822_v24 }
  0x96   : > { %v916_v26 = vpop.permute.xlu0 %915  ;;  %2955 = vmatmul.mubr.msk.f32.vlgmr.msra.gmra.mxu1 %vm298_vm1, %v280_v21  ;;  %v912_v27 = vpop.permute.xlu1 %911  ;;  %990 = vmatprep.mubr.f32.mxu0 %v3109_v0 }
  0x97   : > { %2958 = vmatpush3.msra.mxu1 %v594_v13  ;;  %v918_v28 = vsel %vm917_vm5, %v912_v27, %v914_v23  ;;  %v919_v29 = vsel %vm917_vm5, %v914_v23, %v916_v26  ;;  %2959 = vmatprep.mubr.msk.f32.mxu1 %vm3119_vm3, %v3109_v0 }
  0x98   : > { %956 = vmatprep.subr.mxu0 %v919_v29  ;;  %2962 = vmatprep.subr.mxu1 %v3109_v0 }
  0x99   : > { %957 = vmatpush1.msra.mxu0 %v918_v28 }
  0x9a   : > { %v1075_v31 = vpop.permute.xlu0 %1074  ;;  %2960 = vmatmul.mubr.msk.f32.vlgmr.msra.gmra.mxu1 %vm298_vm1, %v2819_v17  ;;  %2826 = vmatmul.mubr.msk.f32.vlgmr.msra.gmra.mxu0 %vm298_vm1, %v2825_v30  ;;  %v1077_v32 = vpop.permute.xlu1 %1076 }
  0x9b   : > { %2963 = vmatpush3.msra.mxu1 %v755_v19  ;;  %v1080_v33 = vsel %vm1078_vm6, %v1075_v31, %v1077_v32  ;;  %2964 = vmatprep.mubr.msk.f32.mxu1 %vm3119_vm3, %v3109_v0 }
  0x9c   : > { %1117 = vmatprep.subr.mxu0 %v1080_v33  ;;  %2967 = vmatprep.subr.mxu1 %v3109_v0 }
  0x9d   : > { %1151 = vmatprep.mubr.f32.mxu0 %v3109_v0 }
  0x9e   : > { %v1073_v34 = vpop.permute.xlu0 %1072  ;;  %2965 = vmatmul.mubr.msk.f32.vlgmr.msra.gmra.mxu1 %vm298_vm1, %v2822_v24  ;;  %v1236_v35 = vpop.permute.xlu1 %1235 }
  0x9f   : > { %v1079_v37 = vsel %vm1078_vm6, %v1073_v34, %v1075_v31  ;;  %2968 = vmatpush3.msra.mxu1 %v916_v26  ;;  %2969 = vmatprep.mubr.msk.f32.mxu1 %vm3119_vm3, %v3109_v0 }
  0xa0   : > { %1118 = vmatpush1.msra.mxu0 %v1079_v37  ;;  %2972 = vmatprep.subr.mxu1 %v3109_v0 }
  0xa1   : > { %2829 = vmatmul.mubr.msk.f32.vlgmr.msra.gmra.mxu0 %vm298_vm1, %v2828_v36 }
  0xa2   : > { %v1238_v38 = vpop.permute.xlu0 %1237  ;;  %2970 = vmatmul.mubr.msk.f32.vlgmr.msra.gmra.mxu1 %vm298_vm1, %v2825_v30  ;;  %v1234_v39 = vpop.permute.xlu1 %1233  ;;  %1312 = vmatprep.mubr.f32.mxu0 %v3109_v0 }
  0xa3   : > { %2973 = vmatpush3.msra.mxu1 %v1077_v32  ;;  %v1240_v40 = vsel %vm1239_vm7, %v1234_v39, %v1236_v35  ;;  %v1241_v41 = vsel %vm1239_vm7, %v1236_v35, %v1238_v38  ;;  %2974 = vmatprep.mubr.msk.f32.mxu1 %vm3119_vm3, %v3109_v0 }
  0xa4   : > { %1278 = vmatprep.subr.mxu0 %v1241_v41  ;;  %2977 = vmatprep.subr.mxu1 %v3109_v0 }
  0xa5   : > { %1279 = vmatpush1.msra.mxu0 %v1240_v40 }
  0xa6   : > { %v1397_v43 = vpop.permute.xlu0 %1396  ;;  %2975 = vmatmul.mubr.msk.f32.vlgmr.msra.gmra.mxu1 %vm298_vm1, %v2828_v36  ;;  %2832 = vmatmul.mubr.msk.f32.vlgmr.msra.gmra.mxu0 %vm298_vm1, %v2831_v42  ;;  %v1399_v44 = vpop.permute.xlu1 %1398 }
  0xa7   : > { %2978 = vmatpush3.msra.mxu1 %v1238_v38  ;;  %v1402_v45 = vsel %vm1400_vm8, %v1397_v43, %v1399_v44  ;;  %2979 = vmatprep.mubr.msk.f32.mxu1 %vm3119_vm3, %v3109_v0 }
  0xa8   : > { %1439 = vmatprep.subr.mxu0 %v1402_v45  ;;  %2982 = vmatprep.subr.mxu1 %v3109_v0 }
  0xa9   : > { %1473 = vmatprep.mubr.f32.mxu0 %v3109_v0 }
  0xaa   : > { %v1395_v46 = vpop.permute.xlu0 %1394  ;;  %2980 = vmatmul.mubr.msk.f32.vlgmr.msra.gmra.mxu1 %vm298_vm1, %v2831_v42  ;;  %v1558_v47 = vpop.permute.xlu1 %1557 }
  0xab   : > { %v1401_v49 = vsel %vm1400_vm8, %v1395_v46, %v1397_v43  ;;  %2983 = vmatpush3.msra.mxu1 %v1399_v44  ;;  %2984 = vmatprep.mubr.msk.f32.mxu1 %vm3119_vm3, %v3109_v0 }
  0xac   : > { %1440 = vmatpush1.msra.mxu0 %v1401_v49  ;;  %2987 = vmatprep.subr.mxu1 %v3109_v0 }
  0xad   : > { %2835 = vmatmul.mubr.msk.f32.vlgmr.msra.gmra.mxu0 %vm298_vm1, %v2834_v48 }
  0xae   : > { %v1560_v50 = vpop.permute.xlu0 %1559  ;;  %2985 = vmatmul.mubr.msk.f32.vlgmr.msra.gmra.mxu1 %vm298_vm1, %v2834_v48  ;;  %v1556_v51 = vpop.permute.xlu1 %1555  ;;  %1634 = vmatprep.mubr.f32.mxu0 %v3109_v0 }
  0xaf   : > { %v1562_v52 = vsel %vm1561_vm9, %v1556_v51, %v1558_v47  ;;  %2988 = vmatpush3.msra.mxu1 %v1560_v50  ;;  %v1563_v53 = vsel %vm1561_vm9, %v1558_v47, %v1560_v50  ;;  %2989 = vmatprep.mubr.msk.f32.mxu1 %vm3119_vm3, %v3109_v0 }
  0xb0   : > { %1600 = vmatprep.subr.mxu0 %v1563_v53  ;;  %2992 = vmatprep.subr.mxu1 %v3109_v0 }
  0xb1   : > { %1601 = vmatpush1.msra.mxu0 %v1562_v52 }
  0xb2   : > { %2838 = vmatmul.mubr.msk.f32.vlgmr.msra.gmra.mxu0 %vm298_vm1, %v2837_v54  ;;  %2990 = vmatmul.mubr.msk.f32.vlgmr.msra.gmra.mxu1 %vm298_vm1, %v2837_v54 }
  0xb3   : > { %2996 = vmatprep.mubr.msk.f32.mxu1 %vm3119_vm3, %v3109_v0 }
  0xbb   : > { %v1718_v42 = vpop.permute.xlu0 %1717 }
 0x14a   : > { %v368_v55 = vpop.f32.mrf.mxu1 }
 0x14c   : > { %v370_v56 = vpop.f32.mrf.mxu1 }
 0x14e   : > { %v439_v57 = vpop.f32.mrf.mxu1  ;;  %v670_v58 = vpop.f32.mrf.mxu0 }
 0x150   : > { %v2951_v59 = vpop.f32.mrf.mxu1  ;;  %v672_v60 = vpop.f32.mrf.mxu0 }
 0x151   : > { %v1790_v59 = vld [vmem:[%s3562_s3 + $0xf0] sm:$0xff] }
 0x152   : > { %v512_v61 = vpop.f32.mrf.mxu1 }
 0x153   : > { %v513_v10 = vadd.f32 %v512_v61, %v368_v55 }
 0x154   : > { %v514_v62 = vpop.f32.mrf.mxu1 }
 0x155   : > { %v831_v63 = vpop.f32.mrf.mxu0  ;;  %v515_v13 = vadd.f32 %v514_v62, %v370_v56  ;;  %v745_v16 = vadd.f32 %v670_v58, %v513_v10  ;;  %v1775_v58 = vld [vmem:[%s3562_s3 + $0x78] sm:$0xff]  ;;  %v1785_v10 = vld [vmem:[%s3562_s3 + $0xc8] sm:$0xff] }
 0x156   : > { %v583_v1 = vpop.f32.mrf.mxu1 }
 0x157   : > { %v833_v2 = vpop.f32.mrf.mxu0  ;;  %v746_v18 = vadd.f32 %v672_v60, %v515_v13  ;;  %v584_v21 = vadd.f32 %v583_v1, %v439_v57  ;;  %v906_v22 = vadd.f32 %v831_v63, %v745_v16  ;;  %v1791_v57 = vld [vmem:[%s3562_s3 + $0xf8] sm:$0xff]  ;;  %v1774_v60 = vld [vmem:[%s3562_s3 + $0x70] sm:$0xff]  ;;  %v1789_v63 = vld [vmem:[%s3562_s3 + $0xe8] sm:$0xff] }
 0x158   : > { %v2956_v3 = vpop.f32.mrf.mxu1  ;;  %2881 = vmatprep.subr.mxu0 %v1791_v57  ;;  %v1773_v1 = vld [vmem:[%s3562_s3 + $0x68] sm:$0xff]  ;;  %v1768_v13 = vld [vmem:[%s3562_s3 + $0x40] sm:$0xff]  ;;  %v1782_v16 = vld [vmem:[%s3562_s3 + $0xb0] sm:$0xff] }
 0x159   : > { %v907_v24 = vadd.f32 %v833_v2, %v746_v18  ;;  %2882 = vmatpush3.msra.mxu0 %v1775_v58  ;;  %v1788_v2 = vld [vmem:[%s3562_s3 + $0xe0] sm:$0xff]  ;;  %v1781_v18 = vld [vmem:[%s3562_s3 + $0xa8] sm:$0xff] }
 0x15a   : > { %v741_v4 = vpop.f32.mrf.mxu1  ;;  %v992_v5 = vpop.f32.mrf.mxu0  ;;  %2883 = vmatprep.subr.mxu0 %v1790_v59  ;;  %v1772_v3 = vld [vmem:[%s3562_s3 + $0x60] sm:$0xff]  ;;  %v2842_v57 = vld [vmem:[%s3563_s4 + $0x8] sm:$0xff] }
 0x15b   : > { %v747_v25 = vadd.f32 %v741_v4, %v584_v21  ;;  %v1067_v26 = vadd.f32 %v992_v5, %v906_v22  ;;  %2884 = vmatpush3.msra.mxu0 %v1774_v60  ;;  %v1787_v5 = vld [vmem:[%s3562_s3 + $0xd8] sm:$0xff]  ;;  %v1764_v21 = vld [vmem:[%s3562_s3 + $0x20] sm:$0xff] }
 0x15c   : > { %v2961_v6 = vpop.f32.mrf.mxu1  ;;  %v994_v8 = vpop.f32.mrf.mxu0  ;;  %2885 = vmatprep.subr.mxu0 %v1789_v63  ;;  %v1779_v22 = vld [vmem:[%s3562_s3 + $0x98] sm:$0xff]  ;;  %v1942_v59 = vld [vmem:[%s3563_s4] sm:$0xff] }
 0x15d   : > { %v1068_v29 = vadd.f32 %v994_v8, %v907_v24  ;;  %2886 = vmatpush3.msra.mxu0 %v1773_v1  ;;  %v1771_v6 = vld [vmem:[%s3562_s3 + $0x58] sm:$0xff]  ;;  %v1786_v8 = vld [vmem:[%s3562_s3 + $0xd0] sm:$0xff] }
 0x15e   : > { %v902_v7 = vpop.f32.mrf.mxu1  ;;  %2887 = vmatprep.subr.mxu0 %v1788_v2  ;;  %v1763_v24 = vld [vmem:[%s3562_s3 + $0x18] sm:$0xff] }
 0x15f   : > { %v908_v30 = vadd.f32 %v902_v7, %v747_v25  ;;  %v1793_v7 = vld [vmem:[%s3562_s3 + $0x108] sm:$0x1f]  ;;  %2888 = vmatpush3.msra.mxu0 %v1772_v3  ;;  %v1778_v25 = vld [vmem:[%s3562_s3 + $0x90] sm:$0xff]  ;;  %v2847_v1 = vld [vmem:[%s3563_s4 + $0x18] sm:$0xff] }
 0x160   : > { %v2966_v9 = vpop.f32.mrf.mxu1  ;;  %2889 = vmatprep.subr.mxu0 %v1787_v5  ;;  %2993 = vmatpush3.msk.msra.mxu1 %vm1798_vm10, %v1793_v7  ;;  %v2855_v2 = vld [vmem:[%s3563_s4 + $0x38] sm:$0xff]  ;;  %v2849_v5 = vld [vmem:[%s3563_s4 + $0x20] sm:$0xff] }
 0x161   : > { %v1153_v11 = vpop.f32.mrf.mxu0  ;;  %v1770_v9 = vld [vmem:[%s3562_s3 + $0x50] sm:$0xff]  ;;  %2890 = vmatpush3.msra.mxu0 %v1771_v6  ;;  %2994 = vmatprep.subr.mxu1 %v3109_v0  ;;  %v2851_v6 = vld [vmem:[%s3563_s4 + $0x28] sm:$0xff] }
 0x162   : > { %v1063_v12 = vpop.f32.mrf.mxu1  ;;  %v1228_v31 = vadd.f32 %v1153_v11, %v1067_v26  ;;  %2891 = vmatprep.subr.mxu0 %v1786_v8  ;;  %v1769_v11 = vld [vmem:[%s3562_s3 + $0x48] sm:$0xff]  ;;  %v1762_v26 = vld [vmem:[%s3562_s3 + $0x10] sm:$0xff] }
 0x163   : > { %v1155_v14 = vpop.f32.mrf.mxu0  ;;  %v1069_v34 = vadd.f32 %v1063_v12, %v908_v30  ;;  %2892 = vmatpush3.msra.mxu0 %v1770_v9  ;;  %v1784_v12 = vld [vmem:[%s3562_s3 + $0xc0] sm:$0xff]  ;;  %v2853_v8 = vld [vmem:[%s3563_s4 + $0x30] sm:$0xff] }
 0x164   : > { %v2971_v15 = vpop.f32.mrf.mxu1  ;;  %v1229_v35 = vadd.f32 %v1155_v14, %v1068_v29  ;;  %2893 = vmatprep.subr.mxu0 %v1785_v10  ;;  %v1783_v14 = vld [vmem:[%s3562_s3 + $0xb8] sm:$0xff]  ;;  %v1761_v29 = vld [vmem:[%s3562_s3 + $0x8] sm:$0xff]  ;;  %v1776_v30 = vld [vmem:[%s3562_s3 + $0x80] sm:$0xff] }
 0x165   : > { %2894 = vmatpush3.msra.mxu0 %v1769_v11  ;;  %v1767_v15 = vld [vmem:[%s3562_s3 + $0x38] sm:$0xff]  ;;  %v2857_v10 = vld [vmem:[%s3563_s4 + $0x40] sm:$0xff] }
 0x166   : > { %v1224_v17 = vpop.f32.mrf.mxu1  ;;  %v1314_v19 = vpop.f32.mrf.mxu0  ;;  %2895 = vmatprep.subr.mxu0 %v1784_v12 }
 0x167   : > { %v1389_v36 = vadd.f32 %v1314_v19, %v1228_v31  ;;  %v1230_v39 = vadd.f32 %v1224_v17, %v1069_v34  ;;  %2896 = vmatpush3.msra.mxu0 %v1768_v13  ;;  %v1766_v17 = vld [vmem:[%s3562_s3 + $0x30] sm:$0xff]  ;;  %v1765_v19 = vld [vmem:[%s3562_s3 + $0x28] sm:$0xff]  ;;  %v1760_v31 = vld [vmem:[%s3562_s3] sm:$0xff] }
 0x168   : > { %v2976_v20 = vpop.f32.mrf.mxu1  ;;  %v1316_v27 = vpop.f32.mrf.mxu0  ;;  %2897 = vmatprep.subr.mxu0 %v1783_v14 }
 0x169   : > { %v1390_v40 = vadd.f32 %v1316_v27, %v1229_v35  ;;  %2898 = vmatpush3.msra.mxu0 %v1767_v15  ;;  %v1780_v20 = vld [vmem:[%s3562_s3 + $0xa0] sm:$0xff]  ;;  %v1777_v27 = vld [vmem:[%s3562_s3 + $0x88] sm:$0xff] }
 0x16a   : > { %v1385_v23 = vpop.f32.mrf.mxu1  ;;  %2899 = vmatprep.subr.mxu0 %v1782_v16 }
 0x16b   : > { %v1391_v45 = vadd.f32 %v1385_v23, %v1230_v39  ;;  %2900 = vmatpush3.msra.mxu0 %v1766_v17  ;;  %v1792_v23 = vld [vmem:[%s3562_s3 + $0x100] sm:$0xff] }
 0x16c   : > { %v2981_v28 = vpop.f32.mrf.mxu1  ;;  %2901 = vmatprep.subr.mxu0 %v1781_v18  ;;  %2995 = vmatpush3.msra.mxu1 %v1792_v23 }
 0x16d   : > { %v1475_v32 = vpop.f32.mrf.mxu0  ;;  %2902 = vmatpush3.msra.mxu0 %v1765_v19  ;;  %2999 = vmatprep.subr.mxu1 %v3109_v0 }
 0x16e   : > { %v1546_v33 = vpop.f32.mrf.mxu1  ;;  %v1550_v41 = vadd.f32 %v1475_v32, %v1389_v36  ;;  %2903 = vmatprep.subr.mxu0 %v1780_v20 }
 0x16f   : > { %v1477_v37 = vpop.f32.mrf.mxu0  ;;  %v1552_v50 = vadd.f32 %v1546_v33, %v1391_v45  ;;  %2904 = vmatpush3.msra.mxu0 %v1764_v21 }
 0x170   : > { %v2986_v38 = vpop.f32.mrf.mxu1  ;;  %v1551_v46 = vadd.f32 %v1477_v37, %v1390_v40  ;;  %2905 = vmatprep.subr.mxu0 %v1779_v22 }
 0x171   : > { %2906 = vmatpush3.msra.mxu0 %v1763_v24 }
 0x172   : > { %v1636_v43 = vpop.f32.mrf.mxu0  ;;  %v1707_v44 = vpop.f32.mrf.mxu1  ;;  %2907 = vmatprep.subr.mxu0 %v1778_v25 }
 0x173   : > { %v1711_v47 = vadd.f32 %v1636_v43, %v1550_v41  ;;  %v1713_v53 = vadd.f32 %v1707_v44, %v1552_v50  ;;  %2908 = vmatpush3.msra.mxu0 %v1762_v26 }
 0x174   : > { %v1638_v48 = vpop.f32.mrf.mxu0  ;;  %v2991_v49 = vpop.f32.mrf.mxu1  ;;  %2909 = vmatprep.subr.mxu0 %v1777_v27 }
 0x175   : > { %v3308_v51 = vadd.f32 %v1718_v42, %v1711_v47  ;;  %v1712_v52 = vadd.f32 %v1638_v48, %v1551_v46  ;;  %v3326_v61 = vadd.f32 %v1718_v42, %v1713_v53  ;;  %2910 = vmatpush3.msra.mxu0 %v1761_v29 }
 0x176   : > { %2911 = vmatprep.subr.mxu0 %v1776_v30 }
 0x177   : > { %v3310_v54 = vadd.f32 %v1718_v42, %v1712_v52  ;;  %v1723_v55 = vmax.f32 %v3308_v51, 0.0  ;;  %v1725_v4 = vmax.f32 %v3326_v61, 0.0  ;;  %2912 = vmatpush3.msra.mxu0 %v1760_v31  ;;  %v2674_v31 = vld [vmem:[%s3565_s6 + $0x40] sm:$0x1f] }
 0x178   : > { %3034 = vmatprep.subr.mxu0 %v3109_v0 }
 0x179   : > { %v1724_v56 = vmax.f32 %v3310_v54, 0.0 }
 0x17b   : > { %v3091_v62 = vpack.i.bf16 %v1723_v55, %v1724_v56 }
 0x17d   : > { %3092 = vrot.lane.b32.xlu1 %v3091_v62, %s3112_s9  ;;  %v2845_v62 = vld [vmem:[%s3563_s4 + $0x10] sm:$0xff] }
 0x181   : > { %1733 = vrot.lane.b32.xlu1 %v1725_v4, %s3112_s9 }
 0x1ef   : > { %v3093_v28 = vpop.permute.xlu1 %3092 }
 0x1f0   : > { %v3095_v32 = vunpack.i.h.bf16 %v3093_v28  ;;  %v3094_v33 = vunpack.i.l.bf16 %v3093_v28 }
 0x1f2   : > { %v1735_v34 = vsel %vm756_vm4, %v3095_v32, %v3094_v33  ;;  %v2673_v32 = vld [vmem:[%s3565_s6 + $0x38] sm:$0xff] }
 0x1f3   : > { %v1734_v35 = vpop.permute.xlu1 %1733  ;;  %v1740_v39 = vmax.f32 %v1723_v55, %v1735_v34 }
 0x1f4   : > { %v1736_v36 = vsel %vm756_vm4, %v3094_v33, %v1734_v35  ;;  %v1742_v37 = vmax.f32 %v1725_v4, %v1734_v35  ;;  %v2672_v35 = vld [vmem:[%s3565_s6 + $0x30] sm:$0xff] }
 0x1f5   : > { %v1741_v38 = vmax.f32 %v1724_v56, %v1736_v36  ;;  %v2648_v56 = vld [vmem:[%s3564_s5] sm:$0xff] }
 0x1f6   : > { %1750 = vrot.lane.b32.xlu1 %v1742_v37, %s3110_s30 }
 0x1f7   : > { %v3096_v40 = vpack.i.bf16 %v1740_v39, %v1741_v38 }
 0x1f9   : > { %3097 = vrot.lane.b32.xlu0 %v3096_v40, %s3110_s30 }
 0x268   : > { %v1751_v41 = vpop.permute.xlu1 %1750 }
 0x269   : > { %v1759_v42 = vmax.f32 %v1742_v37, %v1751_v41 }
 0x26b   : > { %2997 = vmatmul.mubr.msk.f32.vlgmr.msra.gmra.mxu1 %vm1794_vm11, %v1759_v42  ;;  %v3098_v43 = vpop.permute.xlu0 %3097  ;;  %v2670_v42 = vld [vmem:[%s3565_s6 + $0x20] sm:$0xff] }
 0x26c   : > { %v3100_v44 = vunpack.i.h.bf16 %v3098_v43  ;;  %v3099_v45 = vunpack.i.l.bf16 %v3098_v43  ;;  %3001 = vmatprep.mubr.msk.f32.mxu1 %vm3119_vm3, %v3109_v0 }
 0x26e   : > { %v1752_v46 = vsel %vm292_vm0, %v3100_v44, %v3099_v45  ;;  %v1753_v47 = vsel %vm292_vm0, %v3099_v45, %v1751_v41  ;;  %v2669_v44 = vld [vmem:[%s3565_s6 + $0x18] sm:$0xff] }
 0x26f   : > { %v1757_v48 = vmax.f32 %v1740_v39, %v1752_v46  ;;  %v1758_v49 = vmax.f32 %v1741_v38, %v1753_v47  ;;  %v2671_v38 = vld [vmem:[%s3565_s6 + $0x28] sm:$0xff]  ;;  %v2668_v46 = vld [vmem:[%s3565_s6 + $0x10] sm:$0xff] }
 0x270   : > { %v2667_v47 = vld [vmem:[%s3565_s6 + $0x8] sm:$0xff] }
 0x271   : > { %1866 = vmatprep.mubr.f32.mxu0 %v1758_v49 }
 0x272   : > { %1867 = vmatmul.mubr.f32.vlgmr.msra.gmra.mxu0 %v1757_v48  ;;  %v2666_v48 = vld [vmem:[%s3565_s6] sm:$0xff] }
 0x273   : > { %3036 = vmatprep.mubr.msk.f32.mxu0 %vm3119_vm3, %v3109_v0 }
 0x32b   : > { %v1938_v50 = vpop.f32.mrf.mxu1 }
 0x32d   : > { %v2998_v51 = vpop.f32.mrf.mxu1 }
 0x332   : > { %v2913_v52 = vpop.f32.mrf.mxu0 }
 0x334   : > { %v2914_v53 = vpop.f32.mrf.mxu0 }
 0x335   : > { %v2915_v54 = vadd.f32 %v2914_v53, %v2913_v52 }
 0x337   : > { %v1939_v55 = vadd.f32 %v2915_v54, %v1938_v50 }
 0x339   : > { %2097 = vrot.lane.b32.xlu1 %v1939_v55, %s3111_s8  ;;  %1946 = vrot.lane.b32.xlu0 %v1939_v55, %s3110_s30 }
 0x33d   : > { %2255 = vrot.lane.b32.xlu1 %v1939_v55, %s3120_s15  ;;  %2176 = vrot.lane.b32.xlu0 %v1939_v55, %s3121_s16 }
 0x341   : > { %2413 = vrot.lane.b32.xlu1 %v1939_v55, %s3114_s11  ;;  %2334 = vrot.lane.b32.xlu0 %v1939_v55, %s3122_s17 }
 0x345   : > { %2571 = vrot.lane.b32.xlu1 %v1939_v55, %s3123_s18  ;;  %2492 = vrot.lane.b32.xlu0 %v1939_v55, %s3124_s19 }
 0x349   : > { %2651 = vperm.xlu0 %3090, %v2648_v56  }
 0x3ab   : > { %v1947_v58 = vpop.permute.xlu0 %1946  ;;  %v2098_v61 = vpop.permute.xlu1 %2097 }
 0x3ac   : > { %3000 = vmatpush3.msra.mxu1 %v1947_v58 }
 0x3ad   : > { %3002 = vmatmul.mubr.msk.f32.vlgmr.msra.gmra.mxu1 %vm298_vm1, %v2842_v57  ;;  %3004 = vmatprep.subr.mxu1 %v3109_v0 }
 0x3ae   : > { %3005 = vmatpush3.msra.mxu1 %v1939_v55  ;;  %3006 = vmatprep.mubr.msk.f32.mxu1 %vm3119_vm3, %v3109_v0 }
 0x3af   : > { %v2177_v60 = vpop.permute.xlu0 %2176  ;;  %3009 = vmatprep.subr.mxu1 %v3109_v0  ;;  %v2256_v4 = vpop.permute.xlu1 %2255 }
 0x3b1   : > { %3007 = vmatmul.mubr.msk.f32.vlgmr.msra.gmra.mxu1 %vm298_vm1, %v1942_v59 }
 0x3b2   : > { %3010 = vmatpush3.msra.mxu1 %v2098_v61  ;;  %3011 = vmatprep.mubr.msk.f32.mxu1 %vm3119_vm3, %v3109_v0 }
 0x3b3   : > { %v2335_v63 = vpop.permute.xlu0 %2334  ;;  %3014 = vmatprep.subr.mxu1 %v3109_v0  ;;  %v2414_v7 = vpop.permute.xlu1 %2413 }
 0x3b5   : > { %3012 = vmatmul.mubr.msk.f32.vlgmr.msra.gmra.mxu1 %vm298_vm1, %v2845_v62 }
 0x3b6   : > { %3015 = vmatpush3.msra.mxu1 %v2177_v60  ;;  %3016 = vmatprep.mubr.msk.f32.mxu1 %vm3119_vm3, %v3109_v0 }
 0x3b7   : > { %v2493_v3 = vpop.permute.xlu0 %2492  ;;  %3019 = vmatprep.subr.mxu1 %v3109_v0  ;;  %v2572_v9 = vpop.permute.xlu1 %2571 }
 0x3b8   : > { %3035 = vmatpush3.msra.mxu0 %v2493_v3 }
 0x3b9   : > { %3017 = vmatmul.mubr.msk.f32.vlgmr.msra.gmra.mxu1 %vm298_vm1, %v2847_v1  ;;  %3037 = vmatmul.mubr.msk.f32.vlgmr.msra.gmra.mxu0 %vm298_vm1, %v2855_v2 }
 0x3ba   : > { %3020 = vmatpush3.msra.mxu1 %v2256_v4  ;;  %3021 = vmatprep.mubr.msk.f32.mxu1 %vm3119_vm3, %v3109_v0 }
 0x3bb   : > { %3024 = vmatprep.subr.mxu1 %v3109_v0  ;;  %3044 = vmatprep.subr.mxu0 %v3109_v0 }
 0x3bc   : > { %3062 = vmatprep.mubr.msk.f32.mxu0 %vm3119_vm3, %v3109_v0  ;;  %3045 = vmatpush3.msk.msra.mxu0 %vm1798_vm10, %v2674_v31 }
 0x3bd   : > { %3022 = vmatmul.mubr.msk.f32.vlgmr.msra.gmra.mxu1 %vm298_vm1, %v2849_v5  ;;  %3046 = vmatprep.subr.mxu0 %v3109_v0 }
 0x3be   : > { %3025 = vmatpush3.msra.mxu1 %v2335_v63  ;;  %3026 = vmatprep.mubr.msk.f32.mxu1 %vm3119_vm3, %v3109_v0 }
 0x3bf   : > { %3029 = vmatprep.subr.mxu1 %v3109_v0  ;;  %3047 = vmatpush3.msra.mxu0 %v2673_v32 }
 0x3c0   : > { %3048 = vmatprep.subr.mxu0 %v3109_v0 }
 0x3c1   : > { %3027 = vmatmul.mubr.msk.f32.vlgmr.msra.gmra.mxu1 %vm298_vm1, %v2851_v6  ;;  %3049 = vmatpush3.msra.mxu0 %v2672_v35 }
 0x3c2   : > { %3030 = vmatpush3.msra.mxu1 %v2414_v7  ;;  %3031 = vmatprep.mubr.msk.f32.mxu1 %vm3119_vm3, %v3109_v0 }
 0x3c3   : > { %3039 = vmatprep.subr.mxu1 %v3109_v0  ;;  %3050 = vmatprep.subr.mxu0 %v3109_v0 }
 0x3c4   : > { %v2652_v40 = vpop.permute.xlu0 %2651  ;;  %3051 = vmatpush3.msra.mxu0 %v2671_v38 }
 0x3c5   : > { %3032 = vmatmul.mubr.msk.f32.vlgmr.msra.gmra.mxu1 %vm298_vm1, %v2853_v8  ;;  %3052 = vmatprep.subr.mxu0 %v3109_v0 }
 0x3c6   : > { %3040 = vmatpush3.msra.mxu1 %v2572_v9  ;;  %3041 = vmatprep.mubr.msk.f32.mxu1 %vm3119_vm3, %v3109_v0 }
 0x3c7   : > { %3053 = vmatpush3.msra.mxu0 %v2670_v42 }
 0x3c8   : > { %3054 = vmatprep.subr.mxu0 %v3109_v0 }
 0x3c9   : > { %3042 = vmatmul.mubr.msk.f32.vlgmr.msra.gmra.mxu1 %vm298_vm1, %v2857_v10  ;;  %3055 = vmatpush3.msra.mxu0 %v2669_v44 }
 0x3ca   : > { %3056 = vmatprep.subr.mxu0 %v3109_v0 }
 0x3cb   : > { %3057 = vmatpush3.msra.mxu0 %v2668_v46 }
 0x3cc   : > { %3058 = vmatprep.subr.mxu0 %v3109_v0 }
 0x3cd   : > { %3059 = vmatpush3.msra.mxu0 %v2667_v47 }
 0x3ce   : > { %3060 = vmatprep.subr.mxu0 %v3109_v0 }
 0x3cf   : > { %3061 = vmatpush3.msra.mxu0 %v2666_v48 }
 0x46d   : > { %v2018_v11 = vpop.f32.mrf.mxu1 }
 0x46f   : > { %v3003_v12 = vpop.f32.mrf.mxu1 }
 0x471   : > { %v2091_v13 = vpop.f32.mrf.mxu1 }
 0x472   : > { %v2092_v21 = vadd.f32 %v2091_v13, %v2018_v11 }
 0x473   : > { %v3008_v14 = vpop.f32.mrf.mxu1 }
 0x475   : > { %v2169_v15 = vpop.f32.mrf.mxu1 }
 0x476   : > { %v2173_v23 = vadd.f32 %v2169_v15, %v2092_v21 }
 0x477   : > { %v3013_v16 = vpop.f32.mrf.mxu1 }
 0x479   : > { %v2248_v17 = vpop.f32.mrf.mxu1  ;;  %v2564_v18 = vpop.f32.mrf.mxu0 }
 0x47a   : > { %v2252_v25 = vadd.f32 %v2248_v17, %v2173_v23 }
 0x47b   : > { %v3018_v19 = vpop.f32.mrf.mxu1  ;;  %v3038_v20 = vpop.f32.mrf.mxu0 }
 0x47d   : > { %v2327_v22 = vpop.f32.mrf.mxu1 }
 0x47e   : > { %v2331_v27 = vadd.f32 %v2327_v22, %v2252_v25 }
 0x47f   : > { %v3023_v24 = vpop.f32.mrf.mxu1 }
 0x481   : > { %v2406_v26 = vpop.f32.mrf.mxu1 }
 0x482   : > { %v2410_v29 = vadd.f32 %v2406_v26, %v2331_v27 }
 0x483   : > { %v3028_v28 = vpop.f32.mrf.mxu1 }
 0x485   : > { %v2485_v30 = vpop.f32.mrf.mxu1 }
 0x486   : > { %v2489_v33 = vadd.f32 %v2485_v30, %v2410_v29 }
 0x487   : > { %v3033_v34 = vpop.f32.mrf.mxu1 }
 0x488   : > { %v2568_v36 = vadd.f32 %v2564_v18, %v2489_v33 }
 0x489   : > { %v2643_v37 = vpop.f32.mrf.mxu1 }
 0x48a   : > { %v2647_v39 = vadd.f32 %v2643_v37, %v2568_v36 }
 0x48b   : > { %v3043_v41 = vpop.f32.mrf.mxu1 }
 0x48c   : > { %v2654_v43 = vadd.f32 %v2652_v40, %v2647_v39 }
 0x48e   : > { %v2655_v45 = vmax.f32 %v2654_v43, 0.0 }
 0x490   : > { %2657 = vrot.lane.b32.xlu1 %v2655_v45, %s3121_s16  ;;  %s2813_s16 = sshll.u32 %s3568_s25, 3 }
 0x491   : > { %s276_s8 = scalar_lea.vmem %s3566_s7, %s2813_s16 }
 0x502   : > { %v2658_v49 = vpop.permute.xlu1 %2657 }
 0x503   : > { %v2660_v50 = vmax.f32 %v2655_v45, %v2658_v49 }
 0x505   : > { %2662 = vrot.lane.b32.xlu0 %v2660_v50, %s3110_s30 }
 0x577   : > { %v2663_v51 = vpop.permute.xlu0 %2662 }
 0x578   : > { %v2665_v52 = vmax.f32 %v2660_v50, %v2663_v51 }
 0x57a   : > { %3063 = vmatmul.mubr.msk.f32.vlgmr.msra.gmra.mxu0 %vm2675_vm12, %v2665_v52 }
 0x63a   : > { %v2748_v0 = vpop.f32.mrf.mxu0 }
 0x63b   : > { %2753 = vst.msk [vmem:[%s276_s8] sm:$0xff] %vm2752_vm13, %v2748_v0 }
 0x63c   : > { %v3064_v53 = vpop.f32.mrf.mxu0 }
 0x63d PF: > { %s17_s24 = sadd.s32 1, %s3107_s24  }
 0x63e   : > { %p14_p4 = scmp.ge.s32.totalorder %s17_s24, 4  }
 0x640   :  { %16 = sbr.rel (!%p14_p4) target bundleno = 1 (0x1), region = 94 }

</bundles_post_ra>
